<compile_context>
chip_gen: v7x
topology: tpu7x:2x2x1
jax: 0.10.0
libtpu: 0.0.40
codegen_flags: <defaults>
</compile_context>

<pallas_src>
import functools
import math

import jax
import jax.numpy as jnp
import numpy as np
from jax import lax
from jax.experimental import pallas as pl
from jax.experimental.pallas import tpu as pltpu


def _round_up(x, m):
    return (x + m - 1) // m * m


# ---------------------------------------------------------------------------
# Fused Pallas kernel
# ---------------------------------------------------------------------------
def _cnn_fused_kernel(x_ref, t_ref, scale_ref, bias_ref,
                      w1_ref, b1_ref, w2_ref, b2_ref, out_ref,
                      *, hh, bn, cw):
    """conv(3x3)+BN+ReLU+2x2 maxpool+Linear+ReLU+Linear, one batch block.

    x_ref  : (2*Hh, bn, K_pad)  padded-image tap slabs, rows ordered (i-parity, ih, n)
    t_ref  : (K_pad, 2*CW)      banded conv weights, cols ordered (j-parity, f, jw), lane-padded
    scale_ref, bias_ref : (1, 2*CW)  folded conv-bias + eval BatchNorm (f32)
    w1_ref : (Hh, CW, U_pad)    fc1 weights packed per spatial row ih
    b1_ref : (1, U_pad)         f32
    w2_ref : (U_pad, C_pad)
    b2_ref : (1, C_pad)         f32
    out_ref: (bn, C_pad)        f32
    """
    kpad = x_ref.shape[-1]
    # (2*Hh, bn, K_pad) -> (2*Hh*bn, K_pad): layout-preserving merge (bn % 8 == 0).
    x2 = x_ref[...].reshape(2 * hh * bn, kpad)

    # conv as one banded MXU matmul, f32 accumulation.
    y = jnp.dot(x2, t_ref[...], preferred_element_type=jnp.float32)      # (2*Hh*bn, 2*CW)
    # folded conv bias + eval-mode BatchNorm + ReLU (f32, VPU).
    y = jnp.maximum(y * scale_ref[...] + bias_ref[...], 0.0)

    # 2x2 max-pool: i-parity halves on sublanes, j-parity halves on a 128-aligned lane split.
    half = hh * bn
    y = jnp.maximum(y[:half, :], y[half:, :])                            # (Hh*bn, 2*CW)
    p = jnp.maximum(y[:, :cw], y[:, cw:])                                # (Hh*bn, CW)
    p = p.astype(w1_ref.dtype)

    # fc1 without a flatten relayout: accumulate over spatial rows ih, each slab a
    # sublane-aligned (bn, CW) tile against the pre-packed (CW, U_pad) weight block.
    h = jnp.dot(p[0:bn, :], w1_ref[0], preferred_element_type=jnp.float32)
    for ih in range(1, hh):
        h = h + jnp.dot(p[ih * bn:(ih + 1) * bn, :], w1_ref[ih],
                        preferred_element_type=jnp.float32)

    # TODO(synk): Dropout is inference-mode identity; training-mode BatchNorm
    # (batch statistics) is not implemented.
    h = jnp.maximum(h + b1_ref[...], 0.0)
    out_ref[...] = jnp.dot(h.astype(w2_ref.dtype), w2_ref[...],
                           preferred_element_type=jnp.float32) + b2_ref[...]


# ---------------------------------------------------------------------------
# One-time parameter packing helpers
# ---------------------------------------------------------------------------
def _build_conv_toeplitz(conv_w, W, K_pad, CW):
    """(F,1,3,3) conv weights -> banded matrix (K_pad, 2*CW).

    T[di*(W+2)+c, parity*CW + f*Wh + jw] = w[f, di, c-j] if 0 <= c-j <= 2 else 0,
    with j = 2*jw + parity; columns [F*Wh, CW) of each parity half are zero padding.
    """
    F = conv_w.shape[0]
    Wp = W + 2
    Wh = W // 2
    w = conv_w[:, 0, :, :]                          # (F, 3, 3)

    row = jnp.arange(3 * Wp)
    di = row // Wp
    c = row % Wp

    col = jnp.arange(2 * CW)
    parity = col // CW
    rem = col % CW
    f = jnp.clip(rem // Wh, 0, F - 1)               # clamp padded cols (masked below)
    jw = rem % Wh
    j = 2 * jw + parity
    real_col = rem < F * Wh

    dj = c[:, None] - j[None, :]                    # (3*Wp, 2*CW)
    valid = (dj >= 0) & (dj <= 2) & real_col[None, :]
    djc = jnp.clip(dj, 0, 2)
    T = jnp.where(valid, w[f[None, :], di[:, None], djc], 0.0)
    return jnp.pad(T, ((0, K_pad - 3 * Wp), (0, 0))).astype(jnp.float32)


def make_cnn_forward(params, H, W, *, compute_dtype=jnp.bfloat16, batch_block=256):
    """Pack parameters once, return a per-input forward(x) closure."""
    assert H % 2 == 0 and W % 2 == 0
    F = params["conv_w"].shape[0]
    units, flatten_dim = params["fc1_w"].shape
    C = params["fc2_w"].shape[0]
    Hh, Wh = H // 2, W // 2
    assert flatten_dim == F * Hh * Wh
    Wp = W + 2
    K = 3 * Wp
    K_pad = _round_up(K, 8)            # 54 -> 64: sublane-aligned contraction dim
    CW = _round_up(F * Wh, 128)        # per j-parity lane width (128-aligned pool split)
    CW2 = 2 * CW
    U_pad = _round_up(units, 128)
    C_pad = _round_up(C, 128)

    # ---- packed ONCE: BN fold, banded conv matrix, fc weight permutes/pads ----
    eps = 1e-5
    s = params["bn_gamma"] / jnp.sqrt(params["bn_var"] + eps)                  # (F,)
    beff = (params["conv_b"] - params["bn_mean"]) * s + params["bn_beta"]
    s_cols = jnp.pad(jnp.repeat(s, Wh), (0, CW - F * Wh))
    b_cols = jnp.pad(jnp.repeat(beff, Wh), (0, CW - F * Wh))
    scale_vec = jnp.tile(s_cols, 2).reshape(1, CW2).astype(jnp.float32)
    bias_vec = jnp.tile(b_cols, 2).reshape(1, CW2).astype(jnp.float32)

    T = _build_conv_toeplitz(params["conv_w"], W, K_pad, CW).astype(compute_dtype)

    # fc1: fold the NCHW flatten permutation into the weights, pack per spatial row ih.
    # PyTorch flat index = f*(Hh*Wh) + ih*Wh + jw;  kernel column c = f*Wh + jw per ih.
    w1 = params["fc1_w"].reshape(units, F, Hh, Wh).transpose(2, 1, 3, 0)       # (Hh,F,Wh,U)
    w1 = w1.reshape(Hh, F * Wh, units)
    w1p = jnp.pad(w1, ((0, 0), (0, CW - F * Wh), (0, U_pad - units))).astype(compute_dtype)
    b1 = jnp.pad(params["fc1_b"], (0, U_pad - units)).reshape(1, U_pad).astype(jnp.float32)
    w2p = jnp.pad(params["fc2_w"].T,
                  ((0, U_pad - units), (0, C_pad - C))).astype(compute_dtype)
    b2 = jnp.pad(params["fc2_b"], (0, C_pad - C)).reshape(1, C_pad).astype(jnp.float32)

    def forward(x_nchw):
        N = x_nchw.shape[0]
        assert x_nchw.shape[1:] == (1, H, W)
        N_pad = _round_up(N, 8)
        if N_pad <= batch_block:
            bn = N_pad
        else:
            bn = batch_block
            N_pad = _round_up(N_pad, bn)
        nb = N_pad // bn

        # Per-input prep only: zero-pad, stack the 3 vertical taps along K, order rows
        # (i-parity, ih, n), pad K to 64.
        # TODO(synk): for large mem-bound batches (v5e) build the 3 tap slabs in-kernel
        # from a single padded-image DMA instead of tripling X in HBM.
        img = jnp.pad(x_nchw[:, 0, :, :], ((0, N_pad - N), (1, 1), (1, 1)))    # (N_pad,H+2,Wp)
        slabs = jnp.concatenate([img[:, di:di + H, :] for di in range(3)], axis=-1)
        s_t = slabs.transpose(1, 0, 2)                                         # (H, N_pad, 3*Wp)
        Xa = jnp.concatenate([s_t[0::2], s_t[1::2]], axis=0)                   # (2*Hh, N_pad, 3*Wp)
        Xa = jnp.pad(Xa, ((0, 0), (0, 0), (0, K_pad - K))).astype(compute_dtype)

        kernel = functools.partial(_cnn_fused_kernel, hh=Hh, bn=bn, cw=CW)
        itemsize = jnp.dtype(compute_dtype).itemsize
        flops = 2 * (2 * Hh * N_pad * K_pad * CW2
                     + N_pad * Hh * CW * U_pad
                     + N_pad * U_pad * C_pad)
        bytes_accessed = ((2 * Hh * N_pad * K_pad + K_pad * CW2
                           + Hh * CW * U_pad + U_pad * C_pad) * itemsize
                          + (2 * CW2 + U_pad + C_pad + N_pad * C_pad) * 4)

        out = pl.pallas_call(
            kernel,
            out_shape=jax.ShapeDtypeStruct((N_pad, C_pad), jnp.float32),
            grid=(nb,),
            in_specs=[
                pl.BlockSpec((2 * Hh, bn, K_pad), lambda b: (0, b, 0)),   # batch-blocked
                pl.BlockSpec((K_pad, CW2), lambda b: (0, 0)),             # VMEM-resident
                pl.BlockSpec((1, CW2), lambda b: (0, 0)),
                pl.BlockSpec((1, CW2), lambda b: (0, 0)),
                pl.BlockSpec((Hh, CW, U_pad), lambda b: (0, 0, 0)),
                pl.BlockSpec((1, U_pad), lambda b: (0, 0)),
                pl.BlockSpec((U_pad, C_pad), lambda b: (0, 0)),
                pl.BlockSpec((1, C_pad), lambda b: (0, 0)),
            ],
            out_specs=pl.BlockSpec((bn, C_pad), lambda b: (b, 0)),
            compiler_params=pltpu.CompilerParams(
                dimension_semantics=("parallel",)),
            cost_estimate=pl.CostEstimate(
                flops=int(flops), transcendentals=0,
                bytes_accessed=int(bytes_accessed)),
        )(Xa, T, scale_vec, bias_vec, w1p, b1, w2p, b2)

        return out[:N, :C]

    return forward


# ---------------------------------------------------------------------------
# Pure-JAX reference (mirrors the PyTorch module in eval mode)
# ---------------------------------------------------------------------------
def cnn_reference(x_nchw, params):
    eps = 1e-5
    conv = lax.conv_general_dilated(
        x_nchw, params["conv_w"], window_strides=(1, 1),
        padding=((1, 1), (1, 1)),
        dimension_numbers=("NCHW", "OIHW", "NCHW"))
    conv = conv + params["conv_b"][None, :, None, None]
    bn = ((conv - params["bn_mean"][None, :, None, None])
          / jnp.sqrt(params["bn_var"][None, :, None, None] + eps)
          * params["bn_gamma"][None, :, None, None]
          + params["bn_beta"][None, :, None, None])
    act = jnp.maximum(bn, 0.0)
    pooled = lax.reduce_window(act, -jnp.inf, lax.max,
                               (1, 1, 2, 2), (1, 1, 2, 2), "VALID")
    flat = pooled.reshape(x_nchw.shape[0], -1)
    h = jnp.maximum(flat @ params["fc1_w"].T + params["fc1_b"], 0.0)
    return h @ params["fc2_w"].T + params["fc2_b"]


# ---------------------------------------------------------------------------
if __name__ == "__main__":
    N, H, W = 2, 16, 16
    filters, units, num_classes = 8, 32, 10
    flatten_dim = filters * (H // 2) * (W // 2)

    key = jax.random.PRNGKey(0)
    ks = jax.random.split(key, 12)
    params = {
        "conv_w": 0.2 * jax.random.normal(ks[0], (filters, 1, 3, 3), jnp.float32),
        "conv_b": 0.1 * jax.random.normal(ks[1], (filters,), jnp.float32),
        "bn_gamma": 1.0 + 0.1 * jax.random.normal(ks[2], (filters,), jnp.float32),
        "bn_beta": 0.1 * jax.random.normal(ks[3], (filters,), jnp.float32),
        "bn_mean": 0.1 * jax.random.normal(ks[4], (filters,), jnp.float32),
        "bn_var": 0.5 + jax.random.uniform(ks[5], (filters,), jnp.float32),
        "fc1_w": (1.0 / math.sqrt(flatten_dim))
                 * jax.random.normal(ks[6], (units, flatten_dim), jnp.float32),
        "fc1_b": 0.1 * jax.random.normal(ks[7], (units,), jnp.float32),
        "fc2_w": (1.0 / math.sqrt(units))
                 * jax.random.normal(ks[8], (num_classes, units), jnp.float32),
        "fc2_b": 0.1 * jax.random.normal(ks[9], (num_classes,), jnp.float32),
    }
    x = jax.random.normal(ks[10], (N, 1, H, W), jnp.float32)

    ref = jax.block_until_ready(cnn_reference(x, params))

    # f32 path: tight numerical gate.
    fwd_f32 = jax.jit(make_cnn_forward(params, H, W, compute_dtype=jnp.float32))
    out_f32 = jax.block_until_ready(fwd_f32(x))
    assert out_f32.shape == (N, num_classes), out_f32.shape
    if not np.allclose(np.asarray(out_f32), np.asarray(ref), rtol=1e-4, atol=1e-4):
        raise AssertionError("Pallas CNN (f32) output does not match reference")

    # bf16 operand path (fast path on v6e/v7x MXU): relaxed tolerance.
    fwd_bf16 = jax.jit(make_cnn_forward(params, H, W, compute_dtype=jnp.bfloat16))
    out_bf16 = jax.block_until_ready(fwd_bf16(x))
    assert out_bf16.shape == (N, num_classes), out_bf16.shape
    if not np.allclose(np.asarray(out_bf16), np.asarray(ref), rtol=5e-2, atol=5e-2):
        raise AssertionError("Pallas CNN (bf16) output does not match reference")

    print("KERNEL_OK")
</pallas_src>

<mosaic_0001>
module attributes {stable_mosaic.version = 11 : i64} {
  func.func @_cnn_fused_kernel(%arg0: i32, %arg1: memref<16x8x56xf32, #tpu.memory_space<vmem>>, %arg2: memref<56x256xf32, #tpu.memory_space<vmem>>, %arg3: memref<1x256xf32, #tpu.memory_space<vmem>>, %arg4: memref<1x256xf32, #tpu.memory_space<vmem>>, %arg5: memref<8x128x128xf32, #tpu.memory_space<vmem>>, %arg6: memref<1x128xf32, #tpu.memory_space<vmem>>, %arg7: memref<128x128xf32, #tpu.memory_space<vmem>>, %arg8: memref<1x128xf32, #tpu.memory_space<vmem>>, %arg9: memref<8x128xf32, #tpu.memory_space<vmem>>) attributes {dimension_semantics = [#tpu.dimension_semantics<parallel>], iteration_bounds = array<i64: 1>, scalar_prefetch = 0 : i64, scratch_operands = 0 : i64, tpu.core_type = #tpu.core_type<tc>, window_params = [{transform_indices = @transform_0, window_bounds = array<i64: 16, 8, 56>}, {pipeline_mode = #tpu.pipeline_mode<synchronous>, transform_indices = @transform_1, window_bounds = array<i64: 56, 256>}, {pipeline_mode = #tpu.pipeline_mode<synchronous>, transform_indices = @transform_2, window_bounds = array<i64: 1, 256>}, {pipeline_mode = #tpu.pipeline_mode<synchronous>, transform_indices = @transform_3, window_bounds = array<i64: 1, 256>}, {pipeline_mode = #tpu.pipeline_mode<synchronous>, transform_indices = @transform_4, window_bounds = array<i64: 8, 128, 128>}, {pipeline_mode = #tpu.pipeline_mode<synchronous>, transform_indices = @transform_5, window_bounds = array<i64: 1, 128>}, {pipeline_mode = #tpu.pipeline_mode<synchronous>, transform_indices = @transform_6, window_bounds = array<i64: 128, 128>}, {pipeline_mode = #tpu.pipeline_mode<synchronous>, transform_indices = @transform_7, window_bounds = array<i64: 1, 128>}, {transform_indices = @transform_8, window_bounds = array<i64: 8, 128>}]} {
    %c0 = arith.constant 0 : index
    %c0_0 = arith.constant 0 : index
    %c0_1 = arith.constant 0 : index
    %0 = vector.load %arg1[%c0, %c0_0, %c0_1] : memref<16x8x56xf32, #tpu.memory_space<vmem>>, vector<16x8x56xf32>
    %1 = vector.shape_cast %0 : vector<16x8x56xf32> to vector<128x56xf32>
    %c0_2 = arith.constant 0 : index
    %c0_3 = arith.constant 0 : index
    %2 = vector.load %arg2[%c0_2, %c0_3] : memref<56x256xf32, #tpu.memory_space<vmem>>, vector<56x256xf32>
    %cst = arith.constant dense<0.000000e+00> : vector<128x256xf32>
    %3 = tpu.matmul %1, %2, %cst {dimension_numbers = #tpu.dot_dimension_numbers<[1], [0], [0], [1], [0, 0, 1, 1], [], []>} : vector<128x56xf32>, vector<56x256xf32>, vector<128x256xf32> -> vector<128x256xf32>
    %c0_4 = arith.constant 0 : index
    %c0_5 = arith.constant 0 : index
    %4 = vector.load %arg3[%c0_4, %c0_5] : memref<1x256xf32, #tpu.memory_space<vmem>>, vector<1x256xf32>
    %5 = vector.broadcast %4 : vector<1x256xf32> to vector<128x256xf32>
    %6 = arith.mulf %3, %5 : vector<128x256xf32>
    %c0_6 = arith.constant 0 : index
    %c0_7 = arith.constant 0 : index
    %7 = vector.load %arg4[%c0_6, %c0_7] : memref<1x256xf32, #tpu.memory_space<vmem>>, vector<1x256xf32>
    %8 = vector.broadcast %7 : vector<1x256xf32> to vector<128x256xf32>
    %9 = arith.addf %6, %8 : vector<128x256xf32>
    %cst_8 = arith.constant 0.000000e+00 : f32
    %10 = vector.broadcast %cst_8 : f32 to vector<128x256xf32>
    %11 = arith.maximumf %9, %10 : vector<128x256xf32>
    %12 = vector.extract_strided_slice %11 {offsets = [0, 0], sizes = [64, 256], strides = [1, 1]} : vector<128x256xf32> to vector<64x256xf32>
    %13 = vector.extract_strided_slice %11 {offsets = [64, 0], sizes = [64, 256], strides = [1, 1]} : vector<128x256xf32> to vector<64x256xf32>
    %14 = arith.maximumf %12, %13 : vector<64x256xf32>
    %15 = vector.extract_strided_slice %14 {offsets = [0, 0], sizes = [64, 128], strides = [1, 1]} : vector<64x256xf32> to vector<64x128xf32>
    %16 = vector.extract_strided_slice %14 {offsets = [0, 128], sizes = [64, 128], strides = [1, 1]} : vector<64x256xf32> to vector<64x128xf32>
    %17 = arith.maximumf %15, %16 : vector<64x128xf32>
    %18 = vector.extract_strided_slice %17 {offsets = [0, 0], sizes = [8, 128], strides = [1, 1]} : vector<64x128xf32> to vector<8x128xf32>
    %c0_9 = arith.constant 0 : index
    %c0_10 = arith.constant 0 : index
    %c0_11 = arith.constant 0 : index
    %19 = vector.load %arg5[%c0_9, %c0_10, %c0_11] : memref<8x128x128xf32, #tpu.memory_space<vmem>>, vector<1x128x128xf32>
    %20 = vector.shape_cast %19 : vector<1x128x128xf32> to vector<128x128xf32>
    %cst_12 = arith.constant dense<0.000000e+00> : vector<8x128xf32>
    %21 = tpu.matmul %18, %20, %cst_12 {dimension_numbers = #tpu.dot_dimension_numbers<[1], [0], [0], [1], [0, 0, 1, 1], [], []>} : vector<8x128xf32>, vector<128x128xf32>, vector<8x128xf32> -> vector<8x128xf32>
    %22 = vector.extract_strided_slice %17 {offsets = [8, 0], sizes = [8, 128], strides = [1, 1]} : vector<64x128xf32> to vector<8x128xf32>
    %c1 = arith.constant 1 : index
    %c0_13 = arith.constant 0 : index
    %c0_14 = arith.constant 0 : index
    %23 = vector.load %arg5[%c1, %c0_13, %c0_14] : memref<8x128x128xf32, #tpu.memory_space<vmem>>, vector<1x128x128xf32>
    %24 = vector.shape_cast %23 : vector<1x128x128xf32> to vector<128x128xf32>
    %cst_15 = arith.constant dense<0.000000e+00> : vector<8x128xf32>
    %25 = tpu.matmul %22, %24, %cst_15 {dimension_numbers = #tpu.dot_dimension_numbers<[1], [0], [0], [1], [0, 0, 1, 1], [], []>} : vector<8x128xf32>, vector<128x128xf32>, vector<8x128xf32> -> vector<8x128xf32>
    %26 = arith.addf %21, %25 : vector<8x128xf32>
    %27 = vector.extract_strided_slice %17 {offsets = [16, 0], sizes = [8, 128], strides = [1, 1]} : vector<64x128xf32> to vector<8x128xf32>
    %c2 = arith.constant 2 : index
    %c0_16 = arith.constant 0 : index
    %c0_17 = arith.constant 0 : index
    %28 = vector.load %arg5[%c2, %c0_16, %c0_17] : memref<8x128x128xf32, #tpu.memory_space<vmem>>, vector<1x128x128xf32>
    %29 = vector.shape_cast %28 : vector<1x128x128xf32> to vector<128x128xf32>
    %cst_18 = arith.constant dense<0.000000e+00> : vector<8x128xf32>
    %30 = tpu.matmul %27, %29, %cst_18 {dimension_numbers = #tpu.dot_dimension_numbers<[1], [0], [0], [1], [0, 0, 1, 1], [], []>} : vector<8x128xf32>, vector<128x128xf32>, vector<8x128xf32> -> vector<8x128xf32>
    %31 = arith.addf %26, %30 : vector<8x128xf32>
    %32 = vector.extract_strided_slice %17 {offsets = [24, 0], sizes = [8, 128], strides = [1, 1]} : vector<64x128xf32> to vector<8x128xf32>
    %c3 = arith.constant 3 : index
    %c0_19 = arith.constant 0 : index
    %c0_20 = arith.constant 0 : index
    %33 = vector.load %arg5[%c3, %c0_19, %c0_20] : memref<8x128x128xf32, #tpu.memory_space<vmem>>, vector<1x128x128xf32>
    %34 = vector.shape_cast %33 : vector<1x128x128xf32> to vector<128x128xf32>
    %cst_21 = arith.constant dense<0.000000e+00> : vector<8x128xf32>
    %35 = tpu.matmul %32, %34, %cst_21 {dimension_numbers = #tpu.dot_dimension_numbers<[1], [0], [0], [1], [0, 0, 1, 1], [], []>} : vector<8x128xf32>, vector<128x128xf32>, vector<8x128xf32> -> vector<8x128xf32>
    %36 = arith.addf %31, %35 : vector<8x128xf32>
    %37 = vector.extract_strided_slice %17 {offsets = [32, 0], sizes = [8, 128], strides = [1, 1]} : vector<64x128xf32> to vector<8x128xf32>
    %c4 = arith.constant 4 : index
    %c0_22 = arith.constant 0 : index
    %c0_23 = arith.constant 0 : index
    %38 = vector.load %arg5[%c4, %c0_22, %c0_23] : memref<8x128x128xf32, #tpu.memory_space<vmem>>, vector<1x128x128xf32>
    %39 = vector.shape_cast %38 : vector<1x128x128xf32> to vector<128x128xf32>
    %cst_24 = arith.constant dense<0.000000e+00> : vector<8x128xf32>
    %40 = tpu.matmul %37, %39, %cst_24 {dimension_numbers = #tpu.dot_dimension_numbers<[1], [0], [0], [1], [0, 0, 1, 1], [], []>} : vector<8x128xf32>, vector<128x128xf32>, vector<8x128xf32> -> vector<8x128xf32>
    %41 = arith.addf %36, %40 : vector<8x128xf32>
    %42 = vector.extract_strided_slice %17 {offsets = [40, 0], sizes = [8, 128], strides = [1, 1]} : vector<64x128xf32> to vector<8x128xf32>
    %c5 = arith.constant 5 : index
    %c0_25 = arith.constant 0 : index
    %c0_26 = arith.constant 0 : index
    %43 = vector.load %arg5[%c5, %c0_25, %c0_26] : memref<8x128x128xf32, #tpu.memory_space<vmem>>, vector<1x128x128xf32>
    %44 = vector.shape_cast %43 : vector<1x128x128xf32> to vector<128x128xf32>
    %cst_27 = arith.constant dense<0.000000e+00> : vector<8x128xf32>
    %45 = tpu.matmul %42, %44, %cst_27 {dimension_numbers = #tpu.dot_dimension_numbers<[1], [0], [0], [1], [0, 0, 1, 1], [], []>} : vector<8x128xf32>, vector<128x128xf32>, vector<8x128xf32> -> vector<8x128xf32>
    %46 = arith.addf %41, %45 : vector<8x128xf32>
    %47 = vector.extract_strided_slice %17 {offsets = [48, 0], sizes = [8, 128], strides = [1, 1]} : vector<64x128xf32> to vector<8x128xf32>
    %c6 = arith.constant 6 : index
    %c0_28 = arith.constant 0 : index
    %c0_29 = arith.constant 0 : index
    %48 = vector.load %arg5[%c6, %c0_28, %c0_29] : memref<8x128x128xf32, #tpu.memory_space<vmem>>, vector<1x128x128xf32>
    %49 = vector.shape_cast %48 : vector<1x128x128xf32> to vector<128x128xf32>
    %cst_30 = arith.constant dense<0.000000e+00> : vector<8x128xf32>
    %50 = tpu.matmul %47, %49, %cst_30 {dimension_numbers = #tpu.dot_dimension_numbers<[1], [0], [0], [1], [0, 0, 1, 1], [], []>} : vector<8x128xf32>, vector<128x128xf32>, vector<8x128xf32> -> vector<8x128xf32>
    %51 = arith.addf %46, %50 : vector<8x128xf32>
    %52 = vector.extract_strided_slice %17 {offsets = [56, 0], sizes = [8, 128], strides = [1, 1]} : vector<64x128xf32> to vector<8x128xf32>
    %c7 = arith.constant 7 : index
    %c0_31 = arith.constant 0 : index
    %c0_32 = arith.constant 0 : index
    %53 = vector.load %arg5[%c7, %c0_31, %c0_32] : memref<8x128x128xf32, #tpu.memory_space<vmem>>, vector<1x128x128xf32>
    %54 = vector.shape_cast %53 : vector<1x128x128xf32> to vector<128x128xf32>
    %cst_33 = arith.constant dense<0.000000e+00> : vector<8x128xf32>
    %55 = tpu.matmul %52, %54, %cst_33 {dimension_numbers = #tpu.dot_dimension_numbers<[1], [0], [0], [1], [0, 0, 1, 1], [], []>} : vector<8x128xf32>, vector<128x128xf32>, vector<8x128xf32> -> vector<8x128xf32>
    %56 = arith.addf %51, %55 : vector<8x128xf32>
    %c0_34 = arith.constant 0 : index
    %c0_35 = arith.constant 0 : index
    %57 = vector.load %arg6[%c0_34, %c0_35] : memref<1x128xf32, #tpu.memory_space<vmem>>, vector<1x128xf32>
    %58 = vector.broadcast %57 : vector<1x128xf32> to vector<8x128xf32>
    %59 = arith.addf %56, %58 : vector<8x128xf32>
    %cst_36 = arith.constant 0.000000e+00 : f32
    %60 = vector.broadcast %cst_36 : f32 to vector<8x128xf32>
    %61 = arith.maximumf %59, %60 : vector<8x128xf32>
    %c0_37 = arith.constant 0 : index
    %c0_38 = arith.constant 0 : index
    %62 = vector.load %arg7[%c0_37, %c0_38] : memref<128x128xf32, #tpu.memory_space<vmem>>, vector<128x128xf32>
    %cst_39 = arith.constant dense<0.000000e+00> : vector<8x128xf32>
    %63 = tpu.matmul %61, %62, %cst_39 {dimension_numbers = #tpu.dot_dimension_numbers<[1], [0], [0], [1], [0, 0, 1, 1], [], []>} : vector<8x128xf32>, vector<128x128xf32>, vector<8x128xf32> -> vector<8x128xf32>
    %c0_40 = arith.constant 0 : index
    %c0_41 = arith.constant 0 : index
    %64 = vector.load %arg8[%c0_40, %c0_41] : memref<1x128xf32, #tpu.memory_space<vmem>>, vector<1x128xf32>
    %65 = vector.broadcast %64 : vector<1x128xf32> to vector<8x128xf32>
    %66 = arith.addf %63, %65 : vector<8x128xf32>
    %c0_42 = arith.constant 0 : index
    %c0_43 = arith.constant 0 : index
    %67 = vector.load %arg9[%c0_42, %c0_43] : memref<8x128xf32, #tpu.memory_space<vmem>>, vector<8x128xf32>
    tpu.vector_store %arg9[%c0_42, %c0_43], %66 {strides = array<i32>} : memref<8x128xf32, #tpu.memory_space<vmem>>, vector<8x128xf32>,
    return
  }
  func.func @transform_0(%arg0: i32) -> (i32, i32, i32) {
    %c0_i32 = arith.constant 0 : i32
    %c0_i32_0 = arith.constant 0 : i32
    %c0_i32_1 = arith.constant 0 : i32
    return %c0_i32, %arg0, %c0_i32_0 : i32, i32, i32
  }
  func.func @transform_1(%arg0: i32) -> (i32, i32) {
    %c0_i32 = arith.constant 0 : i32
    %c0_i32_0 = arith.constant 0 : i32
    %c0_i32_1 = arith.constant 0 : i32
    return %c0_i32, %c0_i32_0 : i32, i32
  }
  func.func @transform_2(%arg0: i32) -> (i32, i32) {
    %c0_i32 = arith.constant 0 : i32
    %c0_i32_0 = arith.constant 0 : i32
    %c0_i32_1 = arith.constant 0 : i32
    return %c0_i32, %c0_i32_0 : i32, i32
  }
  func.func @transform_3(%arg0: i32) -> (i32, i32) {
    %c0_i32 = arith.constant 0 : i32
    %c0_i32_0 = arith.constant 0 : i32
    %c0_i32_1 = arith.constant 0 : i32
    return %c0_i32, %c0_i32_0 : i32, i32
  }
  func.func @transform_4(%arg0: i32) -> (i32, i32, i32) {
    %c0_i32 = arith.constant 0 : i32
    %c0_i32_0 = arith.constant 0 : i32
    %c0_i32_1 = arith.constant 0 : i32
    %c0_i32_2 = arith.constant 0 : i32
    return %c0_i32, %c0_i32_0, %c0_i32_1 : i32, i32, i32
  }
  func.func @transform_5(%arg0: i32) -> (i32, i32) {
    %c0_i32 = arith.constant 0 : i32
    %c0_i32_0 = arith.constant 0 : i32
    %c0_i32_1 = arith.constant 0 : i32
    return %c0_i32, %c0_i32_0 : i32, i32
  }
  func.func @transform_6(%arg0: i32) -> (i32, i32) {
    %c0_i32 = arith.constant 0 : i32
    %c0_i32_0 = arith.constant 0 : i32
    %c0_i32_1 = arith.constant 0 : i32
    return %c0_i32, %c0_i32_0 : i32, i32
  }
  func.func @transform_7(%arg0: i32) -> (i32, i32) {
    %c0_i32 = arith.constant 0 : i32
    %c0_i32_0 = arith.constant 0 : i32
    %c0_i32_1 = arith.constant 0 : i32
    return %c0_i32, %c0_i32_0 : i32, i32
  }
  func.func @transform_8(%arg0: i32) -> (i32, i32) {
    %c0_i32 = arith.constant 0 : i32
    %c0_i32_0 = arith.constant 0 : i32
    return %arg0, %c0_i32 : i32, i32
  }
}

</mosaic_0001>

<bundles_post_ra>
// kernel: forward.1
= control target key start
LH: loop header
LB: loop body
LE: loop exit
PB: predicated region body
PF: predicated region fallthrough
CT: control target
= control target key end

     0   :  { %v2050_v3 = vmov 0.0   ;;  %vm59_vm0 = vcmask 457728   ;;  %v2051_v40 = vmov 0.0|0.0   ;;  %vm2052_vm1 = vmmov 0   ;;  %s2913_s1 = inlined_call_operand.vmem [shape: f32[56,256], index: 1, kind: input, shape index: {}]   ;;  %s2914_s0 = inlined_call_operand.vmem [shape: f32[16,8,56], index: 0, kind: input, shape index: {}]   ;;  %s2915_s4 = inlined_call_operand.vmem [shape: f32[8,128,128], index: 4, kind: input, shape index: {}]   ;;  %s2916_s2 = inlined_call_operand.vmem [shape: f32[1,256], index: 2, kind: input, shape index: {}]   ;;  %s2917_s3 = inlined_call_operand.vmem [shape: f32[1,256], index: 3, kind: input, shape index: {}]   ;;  %s2918_s6 = inlined_call_operand.vmem [shape: f32[128,128], index: 6, kind: input, shape index: {}]   ;;  %s2919_s5 = inlined_call_operand.vmem [shape: f32[1,128], index: 5, kind: input, shape index: {}]   ;;  %s2920_s7 = inlined_call_operand.vmem [shape: f32[1,128], index: 7, kind: input, shape index: {}]   ;;  %s2921_s8 = inlined_call_operand.vmem [shape: f32[8,128], index: 8, kind: output, shape index: {}]  }
   0x1   :  { %v46_v0 = vld [vmem:[%s2913_s1 + $0x8] sm:$0xff]  ;;  %v48_v1 = vld [vmem:[%s2913_s1 + $0x18] sm:$0xff]  ;;  %v45_v2 = vld [vmem:[%s2913_s1] sm:$0xff]  ;;  %172 = vmatprep.mubr.f32.mxu0 %v2050_v3  ;;  %1831 = vmatprep.subr.bf16.mxu1 %v2051_v40 }
   0x2   :  { %v1819_v4 = vpack.c.bf16 %v48_v1, %v46_v0  ;;  %v47_v5 = vld [vmem:[%s2913_s1 + $0x10] sm:$0xff]  ;;  %v50_v6 = vld [vmem:[%s2913_s1 + $0x28] sm:$0xff]  ;;  %v52_v7 = vld [vmem:[%s2913_s1 + $0x38] sm:$0xff]  ;;  %1536 = vmatprep.mubr.msk.f32.mxu1 %vm2052_vm1, %v2050_v3 }
   0x3   :  { %v1821_v8 = vpack.c.bf16 %v47_v5, %v45_v2  ;;  %v1823_v9 = vpack.c.bf16 %v52_v7, %v50_v6  ;;  %v49_v10 = vld [vmem:[%s2913_s1 + $0x20] sm:$0xff]  ;;  %v51_v11 = vld [vmem:[%s2913_s1 + $0x30] sm:$0xff]  ;;  %v54_v12 = vld [vmem:[%s2913_s1 + $0x48] sm:$0xff] }
   0x4   :  { %1820 = vmatprep.subr.bf16.mxu0 %v1819_v4  ;;  %v56_v13 = vld [vmem:[%s2913_s1 + $0x58] sm:$0xff]  ;;  %v1825_v14 = vpack.c.bf16 %v51_v11, %v49_v10  ;;  %v53_v16 = vld [vmem:[%s2913_s1 + $0x40] sm:$0xff]  ;;  %v55_v17 = vld [vmem:[%s2913_s1 + $0x50] sm:$0xff] }
   0x5   :  { %1822 = vmatpush1.bf16.msra.mxu0 %v1821_v8  ;;  %v1827_v15 = vpack.c.bf16 %v56_v13, %v54_v12  ;;  %v1829_v18 = vpack.c.bf16 %v55_v17, %v53_v16  ;;  %v58_v19 = vld [vmem:[%s2913_s1 + $0x68] sm:$0xff]  ;;  %v57_v20 = vld [vmem:[%s2913_s1 + $0x60] sm:$0xff]  ;;  %v31_v23 = vld [vmem:[%s2914_s0 + $0x10] sm:$0xff] }
   0x6   :  { %1824 = vmatprep.subr.bf16.mxu0 %v1823_v9  ;;  %v29_v21 = vld [vmem:[%s2914_s0] sm:$0xff]  ;;  %v30_v22 = vld [vmem:[%s2914_s0 + $0x8] sm:$0xff]  ;;  %v32_v24 = vld [vmem:[%s2914_s0 + $0x18] sm:$0xff] }
   0x7   :  { %v33_v25 = vld [vmem:[%s2914_s0 + $0x20] sm:$0xff]  ;;  %v34_v26 = vld [vmem:[%s2914_s0 + $0x28] sm:$0xff]  ;;  %v35_v27 = vld [vmem:[%s2914_s0 + $0x30] sm:$0xff] }
   0x8   :  { %v36_v28 = vld [vmem:[%s2914_s0 + $0x38] sm:$0xff]  ;;  %v37_v29 = vld [vmem:[%s2914_s0 + $0x40] sm:$0xff]  ;;  %v38_v30 = vld [vmem:[%s2914_s0 + $0x48] sm:$0xff] }
   0x9   :  { %1826 = vmatpush1.bf16.msra.mxu0 %v1825_v14  ;;  %v39_v31 = vld [vmem:[%s2914_s0 + $0x50] sm:$0xff]  ;;  %v40_v32 = vld [vmem:[%s2914_s0 + $0x58] sm:$0xff]  ;;  %v41_v33 = vld [vmem:[%s2914_s0 + $0x60] sm:$0xff] }
   0xa   :  { %1828 = vmatprep.subr.bf16.mxu0 %v1827_v15  ;;  %v42_v34 = vld [vmem:[%s2914_s0 + $0x68] sm:$0xff]  ;;  %v43_v35 = vld [vmem:[%s2914_s0 + $0x70] sm:$0xff]  ;;  %v44_v36 = vld [vmem:[%s2914_s0 + $0x78] sm:$0xff] }
   0xb   :  { %v1237_v37 = vld [vmem:[%s2915_s4 + $0x80] sm:$0xff]  ;;  %v1238_v38 = vld [vmem:[%s2915_s4 + $0x88] sm:$0xff]  ;;  %v1239_v41 = vld [vmem:[%s2915_s4 + $0x90] sm:$0xff] }
   0xc   :  { %v1832_v39 = vpack.c.bf16 %v1238_v38, %v1237_v37  ;;  %v1240_v42 = vld [vmem:[%s2915_s4 + $0x98] sm:$0xff]  ;;  %v1253_v43 = vld [vmem:[%s2915_s4 + $0x100] sm:$0xff]  ;;  %v1254_v45 = vld [vmem:[%s2915_s4 + $0x108] sm:$0xff] }
   0xd   :  { %1830 = vmatpush1.bf16.msra.mxu0 %v1829_v18  ;;  %v1835_v44 = vpack.c.bf16 %v1240_v42, %v1239_v41  ;;  %v1880_v46 = vpack.c.bf16 %v1254_v45, %v1253_v43  ;;  %v1241_v47 = vld [vmem:[%s2915_s4 + $0xa0] sm:$0xff]  ;;  %v1242_v48 = vld [vmem:[%s2915_s4 + $0xa8] sm:$0xff]  ;;  %v1255_v49 = vld [vmem:[%s2915_s4 + $0x110] sm:$0xff] }
   0xe   :  { %120 = vmatprep.subr.mxu0 %v58_v19  ;;  %1833 = vmatpush3.bf16.msra.mxu1 %v1832_v39  ;;  %v1838_v50 = vpack.c.bf16 %v1242_v48, %v1241_v47  ;;  %v1256_v51 = vld [vmem:[%s2915_s4 + $0x118] sm:$0xff]  ;;  %v1243_v53 = vld [vmem:[%s2915_s4 + $0xb0] sm:$0xff]  ;;  %v1257_v55 = vld [vmem:[%s2915_s4 + $0x120] sm:$0xff] }
   0xf   :  { %1834 = vmatprep.subr.bf16.mxu1 %v2051_v40  ;;  %v1883_v52 = vpack.c.bf16 %v1256_v51, %v1255_v49  ;;  %v1244_v54 = vld [vmem:[%s2915_s4 + $0xb8] sm:$0xff]  ;;  %v1258_v57 = vld [vmem:[%s2915_s4 + $0x128] sm:$0xff]  ;;  %v1245_v59 = vld [vmem:[%s2915_s4 + $0xc0] sm:$0xff] }
  0x10   :  { %v1841_v56 = vpack.c.bf16 %v1244_v54, %v1243_v53  ;;  %v1886_v58 = vpack.c.bf16 %v1258_v57, %v1257_v55  ;;  %v1246_v60 = vld [vmem:[%s2915_s4 + $0xc8] sm:$0xff]  ;;  %v1259_v61 = vld [vmem:[%s2915_s4 + $0x130] sm:$0xff]  ;;  %v1260_v63 = vld [vmem:[%s2915_s4 + $0x138] sm:$0xff] }
  0x11   :  { %121 = vmatpush1.msra.mxu0 %v57_v20  ;;  %v1844_v62 = vpack.c.bf16 %v1246_v60, %v1245_v59  ;;  %v1889_v0 = vpack.c.bf16 %v1260_v63, %v1259_v61  ;;  %v1247_v1 = vld [vmem:[%s2915_s4 + $0xd0] sm:$0xff]  ;;  %v1248_v2 = vld [vmem:[%s2915_s4 + $0xd8] sm:$0xff]  ;;  %v1261_v4 = vld [vmem:[%s2915_s4 + $0x140] sm:$0xff] }
  0x12   :  { %1221 = vmatmul.mubr.msk.f32.vlgmr.msra.gmra.mrb[0].mxu0 %vm59_vm0, %v29_v21  ;;  %1879 = vmatprep.subr.bf16.mxu0 %v2051_v40  ;;  %v1847_v5 = vpack.c.bf16 %v1248_v2, %v1247_v1  ;;  %v1262_v6 = vld [vmem:[%s2915_s4 + $0x148] sm:$0xff]  ;;  %v1249_v8 = vld [vmem:[%s2915_s4 + $0xe0] sm:$0xff]  ;;  %v1263_v10 = vld [vmem:[%s2915_s4 + $0x150] sm:$0xff] }
  0x13   :  { %178 = vmatprep.mubr.f32.mxu0 %v2050_v3  ;;  %1836 = vmatpush3.bf16.msra.mxu1 %v1835_v44  ;;  %v1892_v7 = vpack.c.bf16 %v1262_v6, %v1261_v4  ;;  %v1250_v9 = vld [vmem:[%s2915_s4 + $0xe8] sm:$0xff]  ;;  %v1264_v12 = vld [vmem:[%s2915_s4 + $0x158] sm:$0xff]  ;;  %v1251_v14 = vld [vmem:[%s2915_s4 + $0xf0] sm:$0xff] }
  0x14   :  { %1881 = vmatpush3.bf16.msra.mxu0 %v1880_v46  ;;  %1837 = vmatprep.subr.bf16.mxu1 %v2051_v40  ;;  %v1850_v11 = vpack.c.bf16 %v1250_v9, %v1249_v8  ;;  %v1895_v13 = vpack.c.bf16 %v1264_v12, %v1263_v10  ;;  %v1252_v15 = vld [vmem:[%s2915_s4 + $0xf8] sm:$0xff]  ;;  %v1265_v16 = vld [vmem:[%s2915_s4 + $0x160] sm:$0xff]  ;;  %v1266_v18 = vld [vmem:[%s2915_s4 + $0x168] sm:$0xff] }
  0x15   :  { %1882 = vmatprep.subr.bf16.mxu0 %v2051_v40  ;;  %v1853_v17 = vpack.c.bf16 %v1252_v15, %v1251_v14  ;;  %v1898_v19 = vpack.c.bf16 %v1266_v18, %v1265_v16  ;;  %v1267_v20 = vld [vmem:[%s2915_s4 + $0x170] sm:$0xff]  ;;  %v1268_v21 = vld [vmem:[%s2915_s4 + $0x178] sm:$0xff] }
  0x16   :  { %1222 = vmatmul.mubr.msk.f32.gmra.mrb[2].mxu0 %vm59_vm0, %v30_v22  ;;  %v1901_v22 = vpack.c.bf16 %v1268_v21, %v1267_v20 }
  0x17   :  { %184 = vmatprep.mubr.f32.mxu0 %v2050_v3  ;;  %1839 = vmatpush3.bf16.msra.mxu1 %v1838_v50 }
  0x18   :  { %1884 = vmatpush3.bf16.msra.mxu0 %v1883_v52  ;;  %1840 = vmatprep.subr.bf16.mxu1 %v2051_v40 }
  0x19   :  { %1885 = vmatprep.subr.bf16.mxu0 %v2051_v40 }
  0x1a   :  { %1223 = vmatmul.mubr.msk.f32.gmra.mrb[4].mxu0 %vm59_vm0, %v31_v23  ;;  %v271_v23 = vlaneseq }
  0x1b   :  { %190 = vmatprep.mubr.f32.mxu0 %v2050_v3  ;;  %1842 = vmatpush3.bf16.msra.mxu1 %v1841_v56 }
  0x1c   :  { %1887 = vmatpush3.bf16.msra.mxu0 %v1886_v58  ;;  %1843 = vmatprep.subr.bf16.mxu1 %v2051_v40 }
  0x1d   :  { %1888 = vmatprep.subr.bf16.mxu0 %v2051_v40 }
  0x1e   :  { %1224 = vmatmul.mubr.msk.f32.gmra.mrb[6].mxu0 %vm59_vm0, %v32_v24 }
  0x1f   :  { %196 = vmatprep.mubr.f32.mxu0 %v2050_v3  ;;  %1845 = vmatpush3.bf16.msra.mxu1 %v1844_v62 }
  0x20   :  { %1890 = vmatpush3.bf16.msra.mxu0 %v1889_v0  ;;  %1846 = vmatprep.subr.bf16.mxu1 %v2051_v40 }
  0x21   :  { %1891 = vmatprep.subr.bf16.mxu0 %v2051_v40 }
  0x22   :  { %1225 = vmatmul.mubr.msk.f32.gmra.mrb[8].mxu0 %vm59_vm0, %v33_v25 }
  0x23   :  { %202 = vmatprep.mubr.f32.mxu0 %v2050_v3  ;;  %1848 = vmatpush3.bf16.msra.mxu1 %v1847_v5 }
  0x24   :  { %1893 = vmatpush3.bf16.msra.mxu0 %v1892_v7  ;;  %1849 = vmatprep.subr.bf16.mxu1 %v2051_v40 }
  0x25   :  { %1894 = vmatprep.subr.bf16.mxu0 %v2051_v40 }
  0x26   :  { %1226 = vmatmul.mubr.msk.f32.gmra.mrb[10].mxu0 %vm59_vm0, %v34_v26  ;;  %v272_v26 = vshrl.u32 %v271_v23, 7 }
  0x27   :  { %208 = vmatprep.mubr.f32.mxu0 %v2050_v3  ;;  %1851 = vmatpush3.bf16.msra.mxu1 %v1850_v11 }
  0x28   :  { %1896 = vmatpush3.bf16.msra.mxu0 %v1895_v13  ;;  %1852 = vmatprep.subr.bf16.mxu1 %v2051_v40 }
  0x29   :  { %1897 = vmatprep.subr.bf16.mxu0 %v2051_v40 }
  0x2a   :  { %1227 = vmatmul.mubr.msk.f32.gmra.mrb[12].mxu0 %vm59_vm0, %v35_v27 }
  0x2b   :  { %214 = vmatprep.mubr.f32.mxu0 %v2050_v3  ;;  %1854 = vmatpush3.bf16.msra.mxu1 %v1853_v17 }
  0x2c   :  { %1899 = vmatpush3.bf16.msra.mxu0 %v1898_v19  ;;  %1855 = vmatprep.subr.bf16.mxu1 %v2051_v40 }
  0x2d   :  { %1900 = vmatprep.subr.bf16.mxu0 %v2051_v40 }
  0x2e   :  { %1228 = vmatmul.mubr.msk.f32.gmra.mrb[14].mxu0 %vm59_vm0, %v36_v28 }
  0x2f   :  { %220 = vmatprep.mubr.f32.mxu0 %v2050_v3 }
  0x30   :  { %1902 = vmatpush3.bf16.msra.mxu0 %v1901_v22 }
  0x31   :  { %1927 = vmatprep.subr.bf16.mxu0 %v2051_v40 }
  0x32   :  { %1229 = vmatmul.mubr.msk.f32.gmra.mrb[16].mxu0 %vm59_vm0, %v37_v29  ;;  %v273_v29 = vsub.s32 0, %v272_v26 }
  0x33   :  { %226 = vmatprep.mubr.f32.mxu0 %v2050_v3 }
  0x36   :  { %1230 = vmatmul.mubr.msk.f32.gmra.mrb[18].mxu0 %vm59_vm0, %v38_v30  ;;  %v269_v30 = vld [vmem:[%s2916_s2] sm:$0x3] }
  0x37   :  { %232 = vmatprep.mubr.f32.mxu0 %v2050_v3 }
  0x3a   :  { %1231 = vmatmul.mubr.msk.f32.gmra.mrb[20].mxu0 %vm59_vm0, %v39_v31  ;;  %v277_v31 = vsub.s32 1, %v272_v26 }
  0x3b   :  { %238 = vmatprep.mubr.f32.mxu0 %v2050_v3 }
  0x3e   :  { %1232 = vmatmul.mubr.msk.f32.gmra.mrb[22].mxu0 %vm59_vm0, %v40_v32 }
  0x3f   :  { %244 = vmatprep.mubr.f32.mxu0 %v2050_v3 }
  0x42   :  { %1233 = vmatmul.mubr.msk.f32.gmra.mrb[24].mxu0 %vm59_vm0, %v41_v33 }
  0x43   :  { %250 = vmatprep.mubr.f32.mxu0 %v2050_v3 }
  0x46   :  { %1234 = vmatmul.mubr.msk.f32.gmra.mrb[26].mxu0 %vm59_vm0, %v42_v34  ;;  %v313_v34 = vld [vmem:[%s2917_s3] sm:$0x3] }
  0x47   :  { %256 = vmatprep.mubr.f32.mxu0 %v2050_v3  ;;  %v2348_v38 = vrot.slane %v313_v34, %v273_v29  ;;  %v2351_v42 = vrot.slane %v313_v34, %v277_v31 }
  0x4a   :  { %1235 = vmatmul.mubr.msk.f32.gmra.mrb[28].mxu0 %vm59_vm0, %v43_v35  ;;  %v2344_v35 = vrot.slane %v269_v30, %v273_v29 }
  0x4b   :  { %262 = vmatprep.mubr.f32.mxu0 %v2050_v3 }
  0x4e   :  { %1236 = vmatmul.mubr.msk.f32.gmra.mrb[30].mxu0 %vm59_vm0, %v44_v36  ;;  %v2346_v36 = vrot.slane %v269_v30, %v277_v31 }
  0x4f   :  { %1606 = vmatprep.mubr.msk.f32.mxu0 %vm2052_vm1, %v2050_v3 }
  0xe5   :  { %v174_v24 = vpop.f32.mrb[0].mxu0 }
  0xe6   :  { %v176_v25 = vpop.f32.mrb[1].mxu0  ;;  %v281_v59 = vmul.f32 %v2344_v35, %v174_v24 }
  0xe7   :  { %v282_v0 = vmul.f32 %v2346_v36, %v176_v25 }
  0xe8   :  { %v325_v4 = vadd.f32 %v2348_v38, %v281_v59 }
  0xe9   :  { %v180_v27 = vpop.f32.mrb[2].mxu0  ;;  %v326_v10 = vadd.f32 %v2351_v42, %v282_v0  ;;  %v415_v0 = vld [vmem:[%s2915_s4 + $0x10] sm:$0xff] }
  0xea   :  { %v182_v28 = vpop.f32.mrb[3].mxu0  ;;  %v283_v7 = vmul.f32 %v2344_v35, %v180_v27  ;;  %v357_v14 = vmax.f32 %v325_v4, 0.0 }
  0xeb   :  { %v284_v11 = vmul.f32 %v2346_v36, %v182_v28  ;;  %v358_v23 = vmax.f32 %v326_v10, 0.0  ;;  %v1285_v10 = vld [vmem:[%s2915_s4 + $0x200] sm:$0xff] }
  0xec   :  { %v327_v18 = vadd.f32 %v2348_v38, %v283_v7 }
  0xed   :  { %v186_v32 = vpop.f32.mrb[4].mxu0  ;;  %v328_v24 = vadd.f32 %v2351_v42, %v284_v11  ;;  %v1286_v11 = vld [vmem:[%s2915_s4 + $0x208] sm:$0xff] }
  0xee   :  { %v188_v33 = vpop.f32.mrb[5].mxu0  ;;  %v285_v15 = vmul.f32 %v2344_v35, %v186_v32 }
  0xef   :  { %v286_v19 = vmul.f32 %v2346_v36, %v188_v33  ;;  %v359_v33 = vmax.f32 %v327_v18, 0.0 }
  0xf0   :  { %v329_v29 = vadd.f32 %v2348_v38, %v285_v15 }
  0xf1   :  { %v192_v37 = vpop.f32.mrb[6].mxu0  ;;  %v330_v34 = vadd.f32 %v2351_v42, %v286_v19 }
  0xf2   :  { %v287_v39 = vmul.f32 %v2344_v35, %v192_v37  ;;  %v194_v41 = vpop.f32.mrb[7].mxu0 }
  0xf3   :  { %v288_v43 = vmul.f32 %v2346_v36, %v194_v41  ;;  %v362_v4 = vmax.f32 %v330_v34, 0.0  ;;  %v1288_v34 = vld [vmem:[%s2915_s4 + $0x218] sm:$0xff] }
  0xf4   :  { %v2355_v44 = vadd.f32 %v2348_v38, %v287_v39 }
  0xf5   :  { %v2358_v45 = vadd.f32 %v2351_v42, %v288_v43  ;;  %v2360_v46 = vpop.f32.mrb[8].mxu0  ;;  %v413_v43 = vld [vmem:[%s2915_s4] sm:$0xff] }
  0xf6   :  { %v2362_v47 = vpop.f32.mrb[9].mxu0  ;;  %v363_v18 = vmax.f32 %v2355_v44, 0.0  ;;  %v418_v44 = vld [vmem:[%s2915_s4 + $0x28] sm:$0xff] }
  0xf9   :  { %v204_v48 = vpop.f32.mrb[10].mxu0 }
  0xfa   :  { %v291_v49 = vmul.f32 %v2344_v35, %v204_v48  ;;  %v206_v50 = vpop.f32.mrb[11].mxu0  ;;  %v414_v48 = vld [vmem:[%s2915_s4 + $0x8] sm:$0xff] }
  0xfb   :  { %v292_v51 = vmul.f32 %v2346_v36, %v206_v50 }
  0xfc   :  { %v2367_v52 = vadd.f32 %v2348_v38, %v291_v49  ;;  %v360_v49 = vmax.f32 %v328_v24, 0.0 }
  0xfd   :  { %v2370_v53 = vadd.f32 %v2351_v42, %v292_v51  ;;  %v210_v54 = vpop.f32.mrb[12].mxu0 }
  0xfe   :  { %v293_v55 = vmul.f32 %v2344_v35, %v210_v54  ;;  %v212_v56 = vpop.f32.mrb[13].mxu0 }
  0xff   :  { %v294_v57 = vmul.f32 %v2346_v36, %v212_v56 }
 0x100   :  { %v2375_v58 = vadd.f32 %v2348_v38, %v293_v55 }
 0x101   :  { %v2379_v60 = vadd.f32 %v2351_v42, %v294_v57  ;;  %v216_v61 = vpop.f32.mrb[14].mxu0  ;;  %v361_v57 = vmax.f32 %v329_v29, 0.0 }
 0x102   :  { %v295_v62 = vmul.f32 %v2344_v35, %v216_v61  ;;  %v218_v63 = vpop.f32.mrb[15].mxu0 }
 0x103   :  { %v296_v1 = vmul.f32 %v2346_v36, %v218_v63  ;;  %v1856_v63 = vpack.c.bf16 %v414_v48, %v413_v43 }
 0x104   :  { %v2385_v2 = vadd.f32 %v2348_v38, %v295_v62 }
 0x105   :  { %v2389_v5 = vadd.f32 %v2351_v42, %v296_v1  ;;  %v222_v6 = vpop.f32.mrb[16].mxu0  ;;  %v416_v1 = vld [vmem:[%s2915_s4 + $0x18] sm:$0xff] }
 0x106   :  { %v297_v8 = vmul.f32 %v2344_v35, %v222_v6  ;;  %v224_v9 = vpop.f32.mrb[17].mxu0  ;;  %v289_v6 = vmul.f32 %v2344_v35, %v2360_v46 }
 0x107   :  { %v298_v12 = vmul.f32 %v2346_v36, %v224_v9 }
 0x108   :  { %v341_v13 = vadd.f32 %v2348_v38, %v297_v8 }
 0x109   :  { %v342_v16 = vadd.f32 %v2351_v42, %v298_v12  ;;  %v228_v17 = vpop.f32.mrb[18].mxu0  ;;  %v290_v12 = vmul.f32 %v2346_v36, %v2362_v47  ;;  %v333_v47 = vadd.f32 %v2348_v38, %v289_v6  ;;  %v1290_v6 = vld [vmem:[%s2915_s4 + $0x228] sm:$0xff] }
 0x10a   :  { %v373_v20 = vmax.f32 %v341_v13, 0.0  ;;  %v299_v21 = vmul.f32 %v2344_v35, %v228_v17  ;;  %v230_v22 = vpop.f32.mrb[19].mxu0  ;;  %v1859_v17 = vpack.c.bf16 %v416_v1, %v415_v0 }
 0x10b   :  { %v374_v25 = vmax.f32 %v342_v16, 0.0  ;;  %v300_v26 = vmul.f32 %v2346_v36, %v230_v22  ;;  %v1928_v22 = vpack.c.bf16 %v1286_v11, %v1285_v10 }
 0x10c   :  { %v2404_v27 = vmax.f32 %v357_v14, %v373_v20  ;;  %v343_v28 = vadd.f32 %v2348_v38, %v299_v21 }
 0x10d   :  { %v2408_v30 = vmax.f32 %v358_v23, %v374_v25  ;;  %v344_v31 = vadd.f32 %v2351_v42, %v300_v26  ;;  %v234_v32 = vpop.f32.mrb[20].mxu0  ;;  %v364_v23 = vmax.f32 %v2358_v45, 0.0  ;;  %v334_v45 = vadd.f32 %v2351_v42, %v290_v12 }
 0x10e   :  { %v375_v37 = vmax.f32 %v343_v28, 0.0  ;;  %v301_v39 = vmul.f32 %v2344_v35, %v234_v32  ;;  %v236_v41 = vpop.f32.mrb[21].mxu0  ;;  %v417_v28 = vld [vmem:[%s2915_s4 + $0x20] sm:$0xff] }
 0x10f   :  { %v405_v50 = vmax.f32 %v2404_v27, %v2408_v30  ;;  %v376_v51 = vmax.f32 %v344_v31, 0.0  ;;  %v302_v54 = vmul.f32 %v2346_v36, %v236_v41  ;;  %v1319_v27 = vld [vmem:[%s2915_s4 + $0x310] sm:$0xff]  ;;  %v1320_v30 = vld [vmem:[%s2915_s4 + $0x318] sm:$0xff] }
 0x110   :  { %v391_v55 = vmax.f32 %v359_v33, %v375_v37  ;;  %v345_v56 = vadd.f32 %v2348_v38, %v301_v39  ;;  %v1287_v33 = vld [vmem:[%s2915_s4 + $0x210] sm:$0xff] }
 0x111   :  { %v392_v59 = vmax.f32 %v360_v49, %v376_v51  ;;  %v346_v61 = vadd.f32 %v2351_v42, %v302_v54  ;;  %v240_v62 = vpop.f32.mrb[22].mxu0  ;;  %v1862_v49 = vpack.c.bf16 %v418_v44, %v417_v28  ;;  %v365_v51 = vmax.f32 %v333_v47, 0.0 }
 0x112   :  { %v377_v7 = vmax.f32 %v345_v56, 0.0  ;;  %v303_v8 = vmul.f32 %v2344_v35, %v240_v62  ;;  %v242_v9 = vpop.f32.mrb[23].mxu0  ;;  %v366_v62 = vmax.f32 %v334_v45, 0.0  ;;  %v369_v44 = vmax.f32 %v2375_v58, 0.0  ;;  %v1293_v58 = vld [vmem:[%s2915_s4 + $0x240] sm:$0xff] }
 0x113   :  { %v378_v13 = vmax.f32 %v346_v61, 0.0  ;;  %v304_v14 = vmul.f32 %v2346_v36, %v242_v9  ;;  %v406_v15 = vmax.f32 %v391_v55, %v392_v59  ;;  %v419_v59 = vld [vmem:[%s2915_s4 + $0x30] sm:$0xff]  ;;  %v420_v61 = vld [vmem:[%s2915_s4 + $0x38] sm:$0xff] }
 0x114   :  { %v393_v46 = vmax.f32 %v361_v57, %v377_v7  ;;  %v347_v16 = vadd.f32 %v2348_v38, %v303_v8  ;;  %v1931_v57 = vpack.c.bf16 %v1288_v34, %v1287_v33  ;;  %v1865_v12 = vpack.c.bf16 %v420_v61, %v419_v59  ;;  %v423_v33 = vld [vmem:[%s2915_s4 + $0x50] sm:$0xff]  ;;  %v425_v61 = vld [vmem:[%s2915_s4 + $0x60] sm:$0xff] }
 0x115   :  { %v394_v19 = vmax.f32 %v362_v4, %v378_v13  ;;  %v348_v20 = vadd.f32 %v2351_v42, %v304_v14  ;;  %v246_v21 = vpop.f32.mrb[24].mxu0  ;;  %1537 = vmatmul.mubr.f32.vlgmr.msra.gmra.mrb[0].mxu1 %v406_v15  ;;  %v1289_v4 = vld [vmem:[%s2915_s4 + $0x220] sm:$0xff]  ;;  %v367_v13 = vmax.f32 %v2367_v52, 0.0  ;;  %v370_v34 = vmax.f32 %v2379_v60, 0.0  ;;  %v1294_v60 = vld [vmem:[%s2915_s4 + $0x248] sm:$0xff] }
 0x116   :  { %v379_v24 = vmax.f32 %v347_v16, 0.0  ;;  %v305_v25 = vmul.f32 %v2344_v35, %v246_v21  ;;  %1857 = vmatpush3.bf16.msra.mxu1 %v1856_v63  ;;  %v248_v26 = vpop.f32.mrb[25].mxu0  ;;  %1571 = vmatprep.mubr.msk.f32.mxu1 %vm2052_vm1, %v2050_v3  ;;  %v1934_v16 = vpack.c.bf16 %v1290_v6, %v1289_v4  ;;  %v1940_v59 = vpack.c.bf16 %v1294_v60, %v1293_v58 }
 0x117   :  { %v407_v29 = vmax.f32 %v393_v46, %v394_v19  ;;  %v380_v31 = vmax.f32 %v348_v20, 0.0  ;;  %v306_v32 = vmul.f32 %v2346_v36, %v248_v26  ;;  %1858 = vmatprep.subr.bf16.mxu1 %v2051_v40  ;;  %v368_v19 = vmax.f32 %v2370_v53, 0.0 }
 0x118   :  { %v2465_v37 = vmax.f32 %v363_v18, %v379_v24  ;;  %v349_v39 = vadd.f32 %v2348_v38, %v305_v25  ;;  %v422_v18 = vld [vmem:[%s2915_s4 + $0x48] sm:$0xff] }
 0x119   :  { %v2468_v41 = vmax.f32 %v364_v23, %v380_v31  ;;  %v350_v43 = vadd.f32 %v2351_v42, %v306_v32  ;;  %v252_v48 = vpop.f32.mrb[26].mxu0  ;;  %1607 = vmatmul.mubr.f32.vlgmr.msra.gmra.mrb[32].mxu0 %v407_v29  ;;  %v1292_v23 = vld [vmem:[%s2915_s4 + $0x238] sm:$0xff] }
 0x11a   :  { %v381_v54 = vmax.f32 %v349_v39, 0.0  ;;  %v307_v55 = vmul.f32 %v2344_v35, %v252_v48  ;;  %1860 = vmatpush3.bf16.msra.mxu1 %v1859_v17  ;;  %1929 = vmatpush3.bf16.msra.mxu0 %v1928_v22  ;;  %v254_v56 = vpop.f32.mrb[27].mxu0  ;;  %v421_v17 = vld [vmem:[%s2915_s4 + $0x40] sm:$0xff]  ;;  %v1291_v22 = vld [vmem:[%s2915_s4 + $0x230] sm:$0xff] }
 0x11b   :  { %v408_v63 = vmax.f32 %v2465_v37, %v2468_v41  ;;  %v382_v0 = vmax.f32 %v350_v43, 0.0  ;;  %v308_v1 = vmul.f32 %v2346_v36, %v254_v56  ;;  %1861 = vmatprep.subr.bf16.mxu1 %v2051_v40  ;;  %1930 = vmatprep.subr.bf16.mxu0 %v2051_v40  ;;  %v1868_v28 = vpack.c.bf16 %v422_v18, %v421_v17  ;;  %v1270_v17 = vld [vmem:[%s2915_s4 + $0x188] sm:$0xff]  ;;  %v1299_v18 = vld [vmem:[%s2915_s4 + $0x270] sm:$0xff] }
 0x11c   :  { %v2489_v7 = vmax.f32 %v365_v51, %v381_v54  ;;  %v351_v8 = vadd.f32 %v2348_v38, %v307_v55  ;;  %1676 = vmatprep.mubr.msk.f32.mxu0 %vm2052_vm1, %v2050_v3  ;;  %v1937_v32 = vpack.c.bf16 %v1292_v23, %v1291_v22  ;;  %v371_v55 = vmax.f32 %v2385_v2, 0.0  ;;  %v1295_v2 = vld [vmem:[%s2915_s4 + $0x250] sm:$0xff]  ;;  %v1272_v23 = vld [vmem:[%s2915_s4 + $0x198] sm:$0xff] }
 0x11d   :  { %v2494_v9 = vmax.f32 %v366_v62, %v382_v0  ;;  %v352_v10 = vadd.f32 %v2351_v42, %v308_v1  ;;  %v258_v11 = vpop.f32.mrb[28].mxu0  ;;  %v372_v62 = vmax.f32 %v2389_v5, 0.0  ;;  %v1296_v5 = vld [vmem:[%s2915_s4 + $0x258] sm:$0xff]  ;;  %v1271_v22 = vld [vmem:[%s2915_s4 + $0x190] sm:$0xff] }
 0x11e   :  { %v383_v14 = vmax.f32 %v351_v8, 0.0  ;;  %v309_v15 = vmul.f32 %v2344_v35, %v258_v11  ;;  %1863 = vmatpush3.bf16.msra.mxu1 %v1862_v49  ;;  %1932 = vmatpush3.bf16.msra.mxu0 %v1931_v57  ;;  %v260_v46 = vpop.f32.mrb[29].mxu0  ;;  %v1943_v8 = vpack.c.bf16 %v1296_v5, %v1295_v2  ;;  %v1307_v41 = vld [vmem:[%s2915_s4 + $0x2b0] sm:$0xff] }
 0x11f   :  { %v409_v52 = vmax.f32 %v2489_v7, %v2494_v9  ;;  %v384_v20 = vmax.f32 %v352_v10, 0.0  ;;  %v310_v21 = vmul.f32 %v2346_v36, %v260_v46  ;;  %1864 = vmatprep.subr.bf16.mxu1 %v2051_v40  ;;  %1933 = vmatprep.subr.bf16.mxu0 %v2051_v40  ;;  %v427_v10 = vld [vmem:[%s2915_s4 + $0x70] sm:$0xff]  ;;  %v1321_v7 = vld [vmem:[%s2915_s4 + $0x320] sm:$0xff]  ;;  %v1322_v9 = vld [vmem:[%s2915_s4 + $0x328] sm:$0xff] }
 0x120   :  { %v2517_v47 = vmax.f32 %v367_v13, %v383_v14  ;;  %v353_v53 = vadd.f32 %v2348_v38, %v309_v15  ;;  %v1297_v13 = vld [vmem:[%s2915_s4 + $0x260] sm:$0xff]  ;;  %v1298_v14 = vld [vmem:[%s2915_s4 + $0x268] sm:$0xff] }
 0x121   :  { %v2520_v24 = vmax.f32 %v368_v19, %v384_v20  ;;  %v354_v25 = vadd.f32 %v2351_v42, %v310_v21  ;;  %v264_v26 = vpop.f32.mrb[30].mxu0  ;;  %v1946_v46 = vpack.c.bf16 %v1298_v14, %v1297_v13  ;;  %v1300_v19 = vld [vmem:[%s2915_s4 + $0x278] sm:$0xff] }
 0x122   :  { %v385_v45 = vmax.f32 %v353_v53, 0.0  ;;  %v311_v29 = vmul.f32 %v2344_v35, %v264_v26  ;;  %1866 = vmatpush3.bf16.msra.mxu1 %v1865_v12  ;;  %1935 = vmatpush3.bf16.msra.mxu0 %v1934_v16  ;;  %v266_v31 = vpop.f32.mrb[31].mxu0  ;;  %v424_v35 = vld [vmem:[%s2915_s4 + $0x58] sm:$0xff]  ;;  %v1269_v16 = vld [vmem:[%s2915_s4 + $0x180] sm:$0xff]  ;;  %v1949_v21 = vpack.c.bf16 %v1300_v19, %v1299_v18  ;;  %v1907_v26 = vpack.c.bf16 %v1272_v23, %v1271_v22 }
 0x123   :  { %v410_v39 = vmax.f32 %v2517_v47, %v2520_v24  ;;  %v386_v43 = vmax.f32 %v354_v25, 0.0  ;;  %v312_v48 = vmul.f32 %v2346_v36, %v266_v31  ;;  %1867 = vmatprep.subr.bf16.mxu1 %v2051_v40  ;;  %1936 = vmatprep.subr.bf16.mxu0 %v2051_v40  ;;  %v1871_v57 = vpack.c.bf16 %v424_v35, %v423_v33  ;;  %v428_v12 = vld [vmem:[%s2915_s4 + $0x78] sm:$0xff]  ;;  %v1317_v53 = vld [vmem:[%s2915_s4 + $0x300] sm:$0xff]  ;;  %v1318_v25 = vld [vmem:[%s2915_s4 + $0x308] sm:$0xff] }
 0x124   :  { %v2543_v49 = vmax.f32 %v369_v44, %v385_v45  ;;  %v355_v36 = vadd.f32 %v2348_v38, %v311_v29  ;;  %v1877_v15 = vpack.c.bf16 %v428_v12, %v427_v10  ;;  %v1904_v20 = vpack.c.bf16 %v1270_v17, %v1269_v16  ;;  %v1273_v44 = vld [vmem:[%s2915_s4 + $0x1a0] sm:$0xff]  ;;  %v1274_v45 = vld [vmem:[%s2915_s4 + $0x1a8] sm:$0xff]  ;;  %v1275_v31 = vld [vmem:[%s2915_s4 + $0x1b0] sm:$0xff] }
 0x125   :  { %v2546_v51 = vmax.f32 %v370_v34, %v386_v43  ;;  %v356_v54 = vadd.f32 %v2351_v42, %v312_v48  ;;  %v426_v42 = vld [vmem:[%s2915_s4 + $0x68] sm:$0xff]  ;;  %v1979_v29 = vpack.c.bf16 %v1320_v30, %v1319_v27  ;;  %v1982_v33 = vpack.c.bf16 %v1322_v9, %v1321_v7  ;;  %v1277_v34 = vld [vmem:[%s2915_s4 + $0x1c0] sm:$0xff]  ;;  %v1323_v48 = vld [vmem:[%s2915_s4 + $0x330] sm:$0xff] }
 0x126   :  { %v387_v56 = vmax.f32 %v355_v36, 0.0  ;;  %1869 = vmatpush3.bf16.msra.mxu1 %v1868_v28  ;;  %1938 = vmatpush3.bf16.msra.mxu0 %v1937_v32  ;;  %v1874_v6 = vpack.c.bf16 %v426_v42, %v425_v61  ;;  %v1976_v28 = vpack.c.bf16 %v1318_v25, %v1317_v53  ;;  %v1276_v32 = vld [vmem:[%s2915_s4 + $0x1b8] sm:$0xff]  ;;  %v1278_v43 = vld [vmem:[%s2915_s4 + $0x1c8] sm:$0xff]  ;;  %v1279_v36 = vld [vmem:[%s2915_s4 + $0x1d0] sm:$0xff] }
 0x127   :  { %v411_v38 = vmax.f32 %v2543_v49, %v2546_v51  ;;  %v388_v0 = vmax.f32 %v356_v54, 0.0  ;;  %1870 = vmatprep.subr.bf16.mxu1 %v2051_v40  ;;  %1939 = vmatprep.subr.bf16.mxu0 %v2051_v40  ;;  %v1324_v35 = vld [vmem:[%s2915_s4 + $0x338] sm:$0xff]  ;;  %v1916_v58 = vpack.c.bf16 %v1278_v43, %v1277_v34  ;;  %v1281_v61 = vld [vmem:[%s2915_s4 + $0x1e0] sm:$0xff]  ;;  %v1330_v12 = vld [vmem:[%s2915_s4 + $0x368] sm:$0xff] }
 0x128   :  { %v2567_v1 = vmax.f32 %v371_v55, %v387_v56  ;;  %v1985_v60 = vpack.c.bf16 %v1324_v35, %v1323_v48  ;;  %v1280_v54 = vld [vmem:[%s2915_s4 + $0x1d8] sm:$0xff]  ;;  %v1325_v55 = vld [vmem:[%s2915_s4 + $0x340] sm:$0xff]  ;;  %v1326_v56 = vld [vmem:[%s2915_s4 + $0x348] sm:$0xff] }
 0x129   :  { %v2569_v4 = vmax.f32 %v372_v62, %v388_v0  ;;  %v1282_v62 = vld [vmem:[%s2915_s4 + $0x1e8] sm:$0xff]  ;;  %v1327_v0 = vld [vmem:[%s2915_s4 + $0x350] sm:$0xff]  ;;  %v1328_v42 = vld [vmem:[%s2915_s4 + $0x358] sm:$0xff] }
 0x12a   :  { %1872 = vmatpush3.bf16.msra.mxu1 %v1871_v57  ;;  %1941 = vmatpush3.bf16.msra.mxu0 %v1940_v59  ;;  %v1919_v57 = vpack.c.bf16 %v1280_v54, %v1279_v36  ;;  %v1988_v59 = vpack.c.bf16 %v1326_v56, %v1325_v55  ;;  %v1922_v2 = vpack.c.bf16 %v1282_v62, %v1281_v61  ;;  %v1329_v10 = vld [vmem:[%s2915_s4 + $0x360] sm:$0xff]  ;;  %v1331_v16 = vld [vmem:[%s2915_s4 + $0x370] sm:$0xff]  ;;  %v1332_v17 = vld [vmem:[%s2915_s4 + $0x378] sm:$0xff] }
 0x12b   :  { %v412_v11 = vmax.f32 %v2567_v1, %v2569_v4  ;;  %1873 = vmatprep.subr.bf16.mxu1 %v2051_v40  ;;  %1942 = vmatprep.subr.bf16.mxu0 %v2051_v40  ;;  %v1991_v5 = vpack.c.bf16 %v1328_v42, %v1327_v0  ;;  %v1994_v14 = vpack.c.bf16 %v1330_v12, %v1329_v10  ;;  %v1305_v23 = vld [vmem:[%s2915_s4 + $0x2a0] sm:$0xff]  ;;  %v1306_v53 = vld [vmem:[%s2915_s4 + $0x2a8] sm:$0xff]  ;;  %v1339_v47 = vld [vmem:[%s2915_s4 + $0x3b0] sm:$0xff] }
 0x12c   :  { %v1997_v19 = vpack.c.bf16 %v1332_v17, %v1331_v16  ;;  %v1958_v37 = vpack.c.bf16 %v1306_v53, %v1305_v23  ;;  %v1309_v49 = vld [vmem:[%s2915_s4 + $0x2c0] sm:$0xff]  ;;  %v1310_v51 = vld [vmem:[%s2915_s4 + $0x2c8] sm:$0xff]  ;;  %v1343_v36 = vld [vmem:[%s2915_s4 + $0x3d0] sm:$0xff] }
 0x12d   :  { %v1314_v27 = vld [vmem:[%s2915_s4 + $0x2e8] sm:$0xff]  ;;  %v1337_v43 = vld [vmem:[%s2915_s4 + $0x3a0] sm:$0xff]  ;;  %v1344_v54 = vld [vmem:[%s2915_s4 + $0x3d8] sm:$0xff] }
 0x12e   :  { %1875 = vmatpush3.bf16.msra.mxu1 %v1874_v6  ;;  %1944 = vmatpush3.bf16.msra.mxu0 %v1943_v8  ;;  %v1283_v6 = vld [vmem:[%s2915_s4 + $0x1f0] sm:$0xff]  ;;  %v1284_v8 = vld [vmem:[%s2915_s4 + $0x1f8] sm:$0xff]  ;;  %v1334_v7 = vld [vmem:[%s2915_s4 + $0x388] sm:$0xff]  ;;  %v2015_v55 = vpack.c.bf16 %v1344_v54, %v1343_v36 }
 0x12f   :  { %1876 = vmatprep.subr.bf16.mxu1 %v2051_v40  ;;  %1945 = vmatprep.subr.bf16.mxu0 %v2051_v40  ;;  %v1925_v13 = vpack.c.bf16 %v1284_v8, %v1283_v6  ;;  %v1338_v48 = vld [vmem:[%s2915_s4 + $0x3a8] sm:$0xff]  ;;  %v1345_v56 = vld [vmem:[%s2915_s4 + $0x3e0] sm:$0xff]  ;;  %v1347_v61 = vld [vmem:[%s2915_s4 + $0x3f0] sm:$0xff] }
 0x130   :  { %v2006_v35 = vpack.c.bf16 %v1338_v48, %v1337_v43  ;;  %v1348_v62 = vld [vmem:[%s2915_s4 + $0x3f8] sm:$0xff]  ;;  %v1123_v42 = vld [vmem:[%s2918_s6] sm:$0xff]  ;;  %v1129_v12 = vld [vmem:[%s2918_s6 + $0x30] sm:$0xff] }
 0x131   :  { %v2021_v0 = vpack.c.bf16 %v1348_v62, %v1347_v61  ;;  %v1126_v8 = vld [vmem:[%s2918_s6 + $0x18] sm:$0xff]  ;;  %v1127_v4 = vld [vmem:[%s2918_s6 + $0x20] sm:$0xff]  ;;  %v1133_v17 = vld [vmem:[%s2918_s6 + $0x50] sm:$0xff] }
 0x132   :  { %1878 = vmatpush3.bf16.msra.mxu1 %v1877_v15  ;;  %1947 = vmatpush3.bf16.msra.mxu0 %v1946_v46  ;;  %v1301_v15 = vld [vmem:[%s2915_s4 + $0x280] sm:$0xff]  ;;  %v1302_v46 = vld [vmem:[%s2915_s4 + $0x288] sm:$0xff] }
 0x133   :  { %1903 = vmatprep.subr.bf16.mxu1 %v2051_v40  ;;  %1948 = vmatprep.subr.bf16.mxu0 %v2051_v40  ;;  %v1952_v18 = vpack.c.bf16 %v1302_v46, %v1301_v15  ;;  %v1131_v15 = vld [vmem:[%s2918_s6 + $0x40] sm:$0xff]  ;;  %v1132_v46 = vld [vmem:[%s2918_s6 + $0x48] sm:$0xff] }
 0x134   :  { %v2036_v16 = vpack.c.bf16 %v1132_v46, %v1131_v15 }
 0x135   :  { %1572 = vmatmul.mubr.f32.vlgmr.msra.gmra.mrb[2].mxu1 %v405_v50  ;;  %v1910_v50 = vpack.c.bf16 %v1274_v45, %v1273_v44  ;;  %v1313_v45 = vld [vmem:[%s2915_s4 + $0x2e0] sm:$0xff] }
 0x136   :  { %1905 = vmatpush3.bf16.msra.mxu1 %v1904_v20  ;;  %1950 = vmatpush3.bf16.msra.mxu0 %v1949_v21  ;;  %v1303_v20 = vld [vmem:[%s2915_s4 + $0x290] sm:$0xff]  ;;  %v1304_v21 = vld [vmem:[%s2915_s4 + $0x298] sm:$0xff]  ;;  %v1970_v30 = vpack.c.bf16 %v1314_v27, %v1313_v45 }
 0x137   :  { %1906 = vmatprep.subr.bf16.mxu1 %v2051_v40  ;;  %1975 = vmatprep.subr.bf16.mxu0 %v2051_v40  ;;  %v1955_v22 = vpack.c.bf16 %v1304_v21, %v1303_v20  ;;  %v1135_v20 = vld [vmem:[%s2918_s6 + $0x60] sm:$0xff]  ;;  %v1136_v21 = vld [vmem:[%s2918_s6 + $0x68] sm:$0xff] }
 0x138   :  { %1641 = vmatprep.mubr.msk.f32.mxu1 %vm2052_vm1, %v2050_v3 }
 0x139   :  { %1677 = vmatmul.mubr.f32.vlgmr.msra.gmra.mrb[34].mxu0 %v409_v52  ;;  %v1913_v52 = vpack.c.bf16 %v1276_v32, %v1275_v31  ;;  %v1333_v32 = vld [vmem:[%s2915_s4 + $0x380] sm:$0xff] }
 0x13a   :  { %1908 = vmatpush3.bf16.msra.mxu1 %v1907_v26  ;;  %1977 = vmatpush3.bf16.msra.mxu0 %v1976_v28  ;;  %v1311_v26 = vld [vmem:[%s2915_s4 + $0x2d0] sm:$0xff]  ;;  %v1312_v28 = vld [vmem:[%s2915_s4 + $0x2d8] sm:$0xff]  ;;  %v2000_v9 = vpack.c.bf16 %v1334_v7, %v1333_v32 }
 0x13b   :  { %1909 = vmatprep.subr.bf16.mxu1 %v2051_v40  ;;  %1978 = vmatprep.subr.bf16.mxu0 %v2051_v40  ;;  %v1967_v44 = vpack.c.bf16 %v1312_v28, %v1311_v26 }
 0x13c   :  { %1746 = vmatprep.mubr.msk.f32.mxu0 %vm2052_vm1, %v2050_v3 }
 0x13e   :  { %1911 = vmatpush3.bf16.msra.mxu1 %v1910_v50  ;;  %1980 = vmatpush3.bf16.msra.mxu0 %v1979_v29  ;;  %v1315_v50 = vld [vmem:[%s2915_s4 + $0x2f0] sm:$0xff]  ;;  %v1316_v29 = vld [vmem:[%s2915_s4 + $0x2f8] sm:$0xff] }
 0x13f   :  { %1912 = vmatprep.subr.bf16.mxu1 %v2051_v40  ;;  %1981 = vmatprep.subr.bf16.mxu0 %v2051_v40  ;;  %v1973_v31 = vpack.c.bf16 %v1316_v29, %v1315_v50 }
 0x142   :  { %1914 = vmatpush3.bf16.msra.mxu1 %v1913_v52  ;;  %1983 = vmatpush3.bf16.msra.mxu0 %v1982_v33  ;;  %v1335_v52 = vld [vmem:[%s2915_s4 + $0x390] sm:$0xff]  ;;  %v1336_v33 = vld [vmem:[%s2915_s4 + $0x398] sm:$0xff] }
 0x143   :  { %1915 = vmatprep.subr.bf16.mxu1 %v2051_v40  ;;  %1984 = vmatprep.subr.bf16.mxu0 %v2051_v40  ;;  %v2003_v34 = vpack.c.bf16 %v1336_v33, %v1335_v52 }
 0x146   :  { %1917 = vmatpush3.bf16.msra.mxu1 %v1916_v58  ;;  %1986 = vmatpush3.bf16.msra.mxu0 %v1985_v60  ;;  %v1342_v58 = vld [vmem:[%s2915_s4 + $0x3c8] sm:$0xff] }
 0x147   :  { %1918 = vmatprep.subr.bf16.mxu1 %v2051_v40  ;;  %1987 = vmatprep.subr.bf16.mxu0 %v2051_v40 }
 0x14a   :  { %1920 = vmatpush3.bf16.msra.mxu1 %v1919_v57  ;;  %1989 = vmatpush3.bf16.msra.mxu0 %v1988_v59  ;;  %v1346_v57 = vld [vmem:[%s2915_s4 + $0x3e8] sm:$0xff] }
 0x14b   :  { %1921 = vmatprep.subr.bf16.mxu1 %v2051_v40  ;;  %1990 = vmatprep.subr.bf16.mxu0 %v2051_v40  ;;  %v2018_v59 = vpack.c.bf16 %v1346_v57, %v1345_v56 }
 0x14e   :  { %1923 = vmatpush3.bf16.msra.mxu1 %v1922_v2  ;;  %1992 = vmatpush3.bf16.msra.mxu0 %v1991_v5  ;;  %v1124_v2 = vld [vmem:[%s2918_s6 + $0x8] sm:$0xff]  ;;  %v1125_v5 = vld [vmem:[%s2918_s6 + $0x10] sm:$0xff] }
 0x14f   :  { %1924 = vmatprep.subr.bf16.mxu1 %v2051_v40  ;;  %1993 = vmatprep.subr.bf16.mxu0 %v2051_v40  ;;  %v2024_v6 = vpack.c.bf16 %v1124_v2, %v1123_v42  ;;  %v2027_v1 = vpack.c.bf16 %v1126_v8, %v1125_v5 }
 0x152   :  { %1926 = vmatpush3.bf16.msra.mxu1 %v1925_v13  ;;  %1995 = vmatpush3.bf16.msra.mxu0 %v1994_v14  ;;  %v1130_v13 = vld [vmem:[%s2918_s6 + $0x38] sm:$0xff] }
 0x153   :  { %1951 = vmatprep.subr.bf16.mxu1 %v2051_v40  ;;  %1996 = vmatprep.subr.bf16.mxu0 %v2051_v40  ;;  %v2033_v14 = vpack.c.bf16 %v1130_v13, %v1129_v12 }
 0x155   :  { %1642 = vmatmul.mubr.f32.vlgmr.msra.gmra.mrb[4].mxu1 %v408_v63  ;;  %v1308_v63 = vld [vmem:[%s2915_s4 + $0x2b8] sm:$0xff] }
 0x156   :  { %1953 = vmatpush3.bf16.msra.mxu1 %v1952_v18  ;;  %1998 = vmatpush3.bf16.msra.mxu0 %v1997_v19  ;;  %v1961_v25 = vpack.c.bf16 %v1308_v63, %v1307_v41  ;;  %v1134_v18 = vld [vmem:[%s2918_s6 + $0x58] sm:$0xff] }
 0x157   :  { %1954 = vmatprep.subr.bf16.mxu1 %v2051_v40  ;;  %1711 = vmatprep.mubr.msk.f32.mxu1 %vm2052_vm1, %v2050_v3  ;;  %v2039_v19 = vpack.c.bf16 %v1134_v18, %v1133_v17  ;;  %v1138_v41 = vld [vmem:[%s2918_s6 + $0x78] sm:$0xff] }
 0x158   :  { %2023 = vmatprep.subr.bf16.mxu0 %v2051_v40 }
 0x159   :  { %1747 = vmatmul.mubr.f32.vlgmr.msra.gmra.mrb[36].mxu0 %v411_v38  ;;  %v1964_v38 = vpack.c.bf16 %v1310_v51, %v1309_v49 }
 0x15a   :  { %1956 = vmatpush3.bf16.msra.mxu1 %v1955_v22  ;;  %1816 = vmatprep.mubr.msk.f32.mxu0 %vm2052_vm1, %v2050_v3  ;;  %v2042_v22 = vpack.c.bf16 %v1136_v21, %v1135_v20 }
 0x15b   :  { %1957 = vmatprep.subr.bf16.mxu1 %v2051_v40  ;;  %2025 = vmatpush3.bf16.msra.mxu0 %v2024_v6 }
 0x15c   :  { %2026 = vmatprep.subr.bf16.mxu0 %v2051_v40 }
 0x15e   :  { %1959 = vmatpush3.bf16.msra.mxu1 %v1958_v37  ;;  %v1137_v37 = vld [vmem:[%s2918_s6 + $0x70] sm:$0xff] }
 0x15f   :  { %1960 = vmatprep.subr.bf16.mxu1 %v2051_v40  ;;  %2028 = vmatpush3.bf16.msra.mxu0 %v2027_v1  ;;  %v2045_v63 = vpack.c.bf16 %v1138_v41, %v1137_v37 }
 0x160   :  { %2029 = vmatprep.subr.bf16.mxu0 %v2051_v40 }
 0x162   :  { %1962 = vmatpush3.bf16.msra.mxu1 %v1961_v25 }
 0x163   :  { %1963 = vmatprep.subr.bf16.mxu1 %v2051_v40 }
 0x166   :  { %1965 = vmatpush3.bf16.msra.mxu1 %v1964_v38 }
 0x167   :  { %1966 = vmatprep.subr.bf16.mxu1 %v2051_v40 }
 0x16a   :  { %1968 = vmatpush3.bf16.msra.mxu1 %v1967_v44 }
 0x16b   :  { %1969 = vmatprep.subr.bf16.mxu1 %v2051_v40 }
 0x16e   :  { %1971 = vmatpush3.bf16.msra.mxu1 %v1970_v30 }
 0x16f   :  { %1972 = vmatprep.subr.bf16.mxu1 %v2051_v40 }
 0x172   :  { %1974 = vmatpush3.bf16.msra.mxu1 %v1973_v31 }
 0x173   :  { %1999 = vmatprep.subr.bf16.mxu1 %v2051_v40 }
 0x175   :  { %1712 = vmatmul.mubr.f32.vlgmr.msra.gmra.mrb[6].mxu1 %v410_v39  ;;  %v1341_v39 = vld [vmem:[%s2915_s4 + $0x3c0] sm:$0xff] }
 0x176   :  { %2001 = vmatpush3.bf16.msra.mxu1 %v2000_v9  ;;  %1781 = vmatprep.mubr.msk.f32.mxu1 %vm2052_vm1, %v2050_v3  ;;  %v1340_v3 = vld [vmem:[%s2915_s4 + $0x3b8] sm:$0xff]  ;;  %v2012_v60 = vpack.c.bf16 %v1342_v58, %v1341_v39 }
 0x177   :  { %2002 = vmatprep.subr.bf16.mxu1 %v2051_v40  ;;  %v2009_v24 = vpack.c.bf16 %v1340_v3, %v1339_v47  ;;  %v1350_v3 = vld [vmem:[%s2920_s7] ss:$0 sm:$0xff] }
 0x17a   :  { %2004 = vmatpush3.bf16.msra.mxu1 %v2003_v34  ;;  %v1349_v34 = vld [vmem:[%s2919_s5] ss:$0 sm:$0xff] }
 0x17b   :  { %2005 = vmatprep.subr.bf16.mxu1 %v2051_v40 }
 0x17e   :  { %2007 = vmatpush3.bf16.msra.mxu1 %v2006_v35 }
 0x17f   :  { %2008 = vmatprep.subr.bf16.mxu1 %v2051_v40 }
 0x182   :  { %2010 = vmatpush3.bf16.msra.mxu1 %v2009_v24 }
 0x183   :  { %2011 = vmatprep.subr.bf16.mxu1 %v2051_v40 }
 0x186   :  { %2013 = vmatpush3.bf16.msra.mxu1 %v2012_v60 }
 0x187   :  { %2014 = vmatprep.subr.bf16.mxu1 %v2051_v40 }
 0x18a   :  { %2016 = vmatpush3.bf16.msra.mxu1 %v2015_v55 }
 0x18b   :  { %2017 = vmatprep.subr.bf16.mxu1 %v2051_v40 }
 0x18e   :  { %2019 = vmatpush3.bf16.msra.mxu1 %v2018_v59 }
 0x18f   :  { %2020 = vmatprep.subr.bf16.mxu1 %v2051_v40 }
 0x192   :  { %2022 = vmatpush3.bf16.msra.mxu1 %v2021_v0 }
 0x195   :  { %1782 = vmatmul.mubr.f32.vlgmr.msra.gmra.mrb[8].mxu1 %v412_v11  ;;  %v1128_v11 = vld [vmem:[%s2918_s6 + $0x28] sm:$0xff] }
 0x196   :  { %v2030_v10 = vpack.c.bf16 %v1128_v11, %v1127_v4 }
 0x198   :  { %2031 = vmatpush3.bf16.msra.mxu0 %v2030_v10 }
 0x199   :  { %2032 = vmatprep.subr.bf16.mxu0 %v2051_v40 }
 0x19c   :  { %2034 = vmatpush3.bf16.msra.mxu0 %v2033_v14 }
 0x19d   :  { %2035 = vmatprep.subr.bf16.mxu0 %v2051_v40 }
 0x1a0   :  { %2037 = vmatpush3.bf16.msra.mxu0 %v2036_v16 }
 0x1a1   :  { %2038 = vmatprep.subr.bf16.mxu0 %v2051_v40 }
 0x1a4   :  { %2040 = vmatpush3.bf16.msra.mxu0 %v2039_v19 }
 0x1a5   :  { %2041 = vmatprep.subr.bf16.mxu0 %v2051_v40 }
 0x1a8   :  { %2043 = vmatpush3.bf16.msra.mxu0 %v2042_v22 }
 0x1a9   :  { %2044 = vmatprep.subr.bf16.mxu0 %v2051_v40 }
 0x1ac   :  { %2046 = vmatpush3.bf16.msra.mxu0 %v2045_v63 }
 0x1e8   :  { %v512_v23 = vpop.f32.mrb[0].mxu1 }
 0x1e9   :  { %v1538_v53 = vpop.f32.mrb[1].mxu1 }
 0x1ec   :  { %v669_v25 = vpop.f32.mrb[32].mxu0 }
 0x1ed   :  { %v1608_v49 = vpop.f32.mrb[33].mxu0 }
 0x208   :  { %v582_v51 = vpop.f32.mrb[2].mxu1 }
 0x209   :  { %v583_v38 = vadd.f32 %v582_v51, %v512_v23  ;;  %v1573_v26 = vpop.f32.mrb[3].mxu1 }
 0x20b   :  { %v673_v28 = vadd.f32 %v669_v25, %v583_v38 }
 0x20c   :  { %v845_v44 = vpop.f32.mrb[34].mxu0 }
 0x20d   :  { %v1678_v45 = vpop.f32.mrb[35].mxu0 }
 0x228   :  { %v757_v27 = vpop.f32.mrb[4].mxu1 }
 0x229   :  { %v761_v40 = vadd.f32 %v757_v27, %v673_v28  ;;  %v1643_v30 = vpop.f32.mrb[5].mxu1 }
 0x22b   :  { %v849_v50 = vadd.f32 %v845_v44, %v761_v40 }
 0x22c   :  { %v1021_v29 = vpop.f32.mrb[36].mxu0 }
 0x22d   :  { %v1748_v31 = vpop.f32.mrb[37].mxu0 }
 0x248   :  { %v933_v32 = vpop.f32.mrb[6].mxu1 }
 0x249   :  { %v937_v7 = vadd.f32 %v933_v32, %v849_v50  ;;  %v1713_v9 = vpop.f32.mrb[7].mxu1 }
 0x24b   :  { %v1025_v52 = vadd.f32 %v1021_v29, %v937_v7 }
 0x268   :  { %v1109_v33 = vpop.f32.mrb[8].mxu1 }
 0x269   :  { %v1113_v43 = vadd.f32 %v1109_v33, %v1025_v52  ;;  %v1783_v48 = vpop.f32.mrb[9].mxu1 }
 0x26b   :  { %v1121_v35 = vadd.f32 %v1349_v34, %v1113_v43 }
 0x26d   :  { %v1122_v47 = vmax.f32 %v1121_v35, 0.0 }
 0x26f   :  { %1817 = vmatmul.mubr.f32.vlgmr.msra.gmra.mrb[38].mxu0 %v1122_v47 }
 0x342   :  { %v1212_v24 = vpop.f32.mrb[38].mxu0 }
 0x343   :  { %v1213_v39 = vadd.f32 %v1350_v3, %v1212_v24  ;;  %v1818_v58 = vpop.f32.mrb[39].mxu0 }
 0x345   :  { %1216 = vst [vmem:[%s2921_s8] sm:$0xff] %v1213_v39 }

</bundles_post_ra>
